<compile_context>
chip_gen: v6e
topology: v6e:2x2x1
jax: 0.10.0
libtpu: 0.0.40
codegen_flags: <defaults>
</compile_context>

<pallas_src>
import jax
import jax.numpy as jnp
from jax.experimental import pallas as pl
from jax.experimental.pallas import tpu as pltpu


def _gelu_exact(x):
    # PyTorch nn.GELU() default: exact erf-based GELU.
    return 0.5 * x * (1.0 + jax.lax.erf(x * (1.0 / jnp.sqrt(2.0).astype(x.dtype))))


def _decoder_mlp_kernel(x_ref, w1_ref, b1_ref, w2_ref, b2_ref, w3_ref, b3_ref, o_ref):
    # x tile is already f32; no redundant cast. Weights/biases are VMEM-resident.
    x = x_ref[...]

    h1 = jnp.dot(x, w1_ref[...], preferred_element_type=jnp.float32) + b1_ref[...]
    h1 = _gelu_exact(h1)

    h2 = jnp.dot(h1, w2_ref[...], preferred_element_type=jnp.float32) + b2_ref[...]
    h2 = _gelu_exact(h2)

    h3 = jnp.dot(h2, w3_ref[...], preferred_element_type=jnp.float32) + b3_ref[...]
    o_ref[...] = h3.astype(o_ref.dtype)


def _round_up(v, m):
    return (v + m - 1) // m * m


def decoder_forward(x, params, *, tile_m=512):
    """x: (B, S, D) float32. params: dict of weights/biases (W stored as (in, out))."""
    B, S, D = x.shape
    hid = params["w1"].shape[1]          # 2 * D
    out_dim = params["w3"].shape[1]
    M = B * S

    # Lane-dense padding: feature / hidden / output dims to multiples of 128.
    D_pad = _round_up(D, 128)
    H_pad = _round_up(hid, 128)
    O_pad = _round_up(out_dim, 128)

    # Row tile: up to `tile_m` rows per grid step, 8-aligned sublanes.
    TILE_M = min(tile_m, _round_up(M, 8))
    M_pad = _round_up(M, TILE_M)

    f32 = jnp.float32
    x2d = jnp.zeros((M_pad, D_pad), x.dtype).at[:M, :D].set(x.reshape(M, D))
    # Zero padding keeps padded lanes inert: GELU(0 + 0) == 0, zero rows of W
    # contribute nothing to downstream matmuls.
    w1 = jnp.zeros((D_pad, H_pad), f32).at[:D, :hid].set(params["w1"])
    b1 = jnp.zeros((1, H_pad), f32).at[:, :hid].set(params["b1"])
    w2 = jnp.zeros((H_pad, D_pad), f32).at[:hid, :D].set(params["w2"])
    b2 = jnp.zeros((1, D_pad), f32).at[:, :D].set(params["b2"])
    w3 = jnp.zeros((D_pad, O_pad), f32).at[:D, :out_dim].set(params["w3"])
    b3 = jnp.zeros((1, O_pad), f32).at[:, :out_dim].set(params["b3"])

    grid = (M_pad // TILE_M,)

    flops = 2 * M_pad * (D_pad * H_pad + H_pad * D_pad + D_pad * O_pad)
    transcendentals = M_pad * (H_pad + D_pad)          # one erf per hidden element
    bytes_accessed = 4 * (
        M_pad * D_pad + M_pad * O_pad                   # activations in/out
        + D_pad * H_pad + H_pad * D_pad + D_pad * O_pad  # weights
        + H_pad + D_pad + O_pad                          # biases
    )

    y2d = pl.pallas_call(
        _decoder_mlp_kernel,
        out_shape=jax.ShapeDtypeStruct((M_pad, O_pad), x.dtype),
        grid=grid,
        in_specs=[
            pl.BlockSpec((TILE_M, D_pad), lambda i: (i, 0)),   # x tile (pipelined)
            pl.BlockSpec((D_pad, H_pad), lambda i: (0, 0)),    # w1 (resident)
            pl.BlockSpec((1, H_pad), lambda i: (0, 0)),        # b1
            pl.BlockSpec((H_pad, D_pad), lambda i: (0, 0)),    # w2
            pl.BlockSpec((1, D_pad), lambda i: (0, 0)),        # b2
            pl.BlockSpec((D_pad, O_pad), lambda i: (0, 0)),    # w3
            pl.BlockSpec((1, O_pad), lambda i: (0, 0)),        # b3
        ],
        out_specs=pl.BlockSpec((TILE_M, O_pad), lambda i: (i, 0)),
        compiler_params=pltpu.CompilerParams(
            dimension_semantics=("parallel",),
        ),
        cost_estimate=pl.CostEstimate(
            flops=flops,
            transcendentals=transcendentals,
            bytes_accessed=bytes_accessed,
        ),
    )(x2d, w1, b1, w2, b2, w3, b3)

    return y2d[:M, :out_dim].reshape(B, S, out_dim)


def init_params(key, transformer_out, out_put_total):
    """Deterministic init mimicking nn.Linear (uniform +/- 1/sqrt(fan_in)).
    Weights stored transposed as (in_features, out_features)."""
    d = transformer_out
    shapes = [
        (d, 2 * d),         # Linear 1
        (2 * d, d),         # Linear 2
        (d, out_put_total)  # Linear 3
    ]
    params = {}
    keys = jax.random.split(key, 2 * len(shapes))
    for i, (fan_in, fan_out) in enumerate(shapes):
        bound = 1.0 / (fan_in ** 0.5)
        w = jax.random.uniform(keys[2 * i], (fan_in, fan_out), jnp.float32, -bound, bound)
        b = jax.random.uniform(keys[2 * i + 1], (1, fan_out), jnp.float32, -bound, bound)
        params[f"w{i+1}"] = w
        params[f"b{i+1}"] = b
    return params


def decoder_ref(x, params):
    """Pure-JAX reference for correctness check."""
    h = jnp.dot(x, params["w1"]) + params["b1"][0]
    h = _gelu_exact(h)
    h = jnp.dot(h, params["w2"]) + params["b2"][0]
    h = _gelu_exact(h)
    return jnp.dot(h, params["w3"]) + params["b3"][0]


if __name__ == "__main__":
    B, S = 2, 8
    transformer_out = 32
    out_put_total = 16

    key = jax.random.PRNGKey(0)
    kx, kp = jax.random.split(key)
    x = jax.random.normal(kx, (B, S, transformer_out), dtype=jnp.float32)
    params = init_params(kp, transformer_out, out_put_total)

    y = decoder_forward(x, params)
    y = jax.block_until_ready(y)

    y_ref = decoder_ref(x, params)
    assert y.shape == (B, S, out_put_total)
    assert jnp.allclose(y, y_ref, atol=1e-5, rtol=1e-5), "Pallas output mismatch vs reference"

    print("KERNEL_OK")
</pallas_src>

<mosaic_0001>
module attributes {stable_mosaic.version = 11 : i64} {
  func.func @_decoder_mlp_kernel(%arg0: i32, %arg1: memref<16x128xf32, #tpu.memory_space<vmem>>, %arg2: memref<128x128xf32, #tpu.memory_space<vmem>>, %arg3: memref<1x128xf32, #tpu.memory_space<vmem>>, %arg4: memref<128x128xf32, #tpu.memory_space<vmem>>, %arg5: memref<1x128xf32, #tpu.memory_space<vmem>>, %arg6: memref<128x128xf32, #tpu.memory_space<vmem>>, %arg7: memref<1x128xf32, #tpu.memory_space<vmem>>, %arg8: memref<16x128xf32, #tpu.memory_space<vmem>>) attributes {dimension_semantics = [#tpu.dimension_semantics<parallel>], iteration_bounds = array<i64: 1>, scalar_prefetch = 0 : i64, scratch_operands = 0 : i64, tpu.core_type = #tpu.core_type<tc>, window_params = [{transform_indices = @transform_0, window_bounds = array<i64: 16, 128>}, {pipeline_mode = #tpu.pipeline_mode<synchronous>, transform_indices = @transform_1, window_bounds = array<i64: 128, 128>}, {pipeline_mode = #tpu.pipeline_mode<synchronous>, transform_indices = @transform_2, window_bounds = array<i64: 1, 128>}, {pipeline_mode = #tpu.pipeline_mode<synchronous>, transform_indices = @transform_3, window_bounds = array<i64: 128, 128>}, {pipeline_mode = #tpu.pipeline_mode<synchronous>, transform_indices = @transform_4, window_bounds = array<i64: 1, 128>}, {pipeline_mode = #tpu.pipeline_mode<synchronous>, transform_indices = @transform_5, window_bounds = array<i64: 128, 128>}, {pipeline_mode = #tpu.pipeline_mode<synchronous>, transform_indices = @transform_6, window_bounds = array<i64: 1, 128>}, {transform_indices = @transform_7, window_bounds = array<i64: 16, 128>}]} {
    %c0 = arith.constant 0 : index
    %c0_0 = arith.constant 0 : index
    %0 = vector.load %arg1[%c0, %c0_0] : memref<16x128xf32, #tpu.memory_space<vmem>>, vector<16x128xf32>
    %c0_1 = arith.constant 0 : index
    %c0_2 = arith.constant 0 : index
    %1 = vector.load %arg2[%c0_1, %c0_2] : memref<128x128xf32, #tpu.memory_space<vmem>>, vector<128x128xf32>
    %cst = arith.constant dense<0.000000e+00> : vector<16x128xf32>
    %2 = tpu.matmul %0, %1, %cst {dimension_numbers = #tpu.dot_dimension_numbers<[1], [0], [0], [1], [0, 0, 1, 1], [], []>} : vector<16x128xf32>, vector<128x128xf32>, vector<16x128xf32> -> vector<16x128xf32>
    %c0_3 = arith.constant 0 : index
    %c0_4 = arith.constant 0 : index
    %3 = vector.load %arg3[%c0_3, %c0_4] : memref<1x128xf32, #tpu.memory_space<vmem>>, vector<1x128xf32>
    %4 = vector.broadcast %3 : vector<1x128xf32> to vector<16x128xf32>
    %5 = arith.addf %2, %4 : vector<16x128xf32>
    %cst_5 = arith.constant 5.000000e-01 : f32
    %6 = vector.broadcast %cst_5 : f32 to vector<16x128xf32>
    %7 = arith.mulf %6, %5 : vector<16x128xf32>
    %cst_6 = arith.constant 2.000000e+00 : f32
    %8 = math.sqrt %cst_6 : f32
    %cst_7 = arith.constant 1.000000e+00 : f32
    %9 = arith.divf %cst_7, %8 : f32
    %10 = vector.broadcast %9 : f32 to vector<16x128xf32>
    %11 = arith.mulf %5, %10 : vector<16x128xf32>
    %12 = math.erf %11 : vector<16x128xf32>
    %cst_8 = arith.constant 1.000000e+00 : f32
    %13 = vector.broadcast %cst_8 : f32 to vector<16x128xf32>
    %14 = arith.addf %13, %12 : vector<16x128xf32>
    %15 = arith.mulf %7, %14 : vector<16x128xf32>
    %c0_9 = arith.constant 0 : index
    %c0_10 = arith.constant 0 : index
    %16 = vector.load %arg4[%c0_9, %c0_10] : memref<128x128xf32, #tpu.memory_space<vmem>>, vector<128x128xf32>
    %cst_11 = arith.constant dense<0.000000e+00> : vector<16x128xf32>
    %17 = tpu.matmul %15, %16, %cst_11 {dimension_numbers = #tpu.dot_dimension_numbers<[1], [0], [0], [1], [0, 0, 1, 1], [], []>} : vector<16x128xf32>, vector<128x128xf32>, vector<16x128xf32> -> vector<16x128xf32>
    %c0_12 = arith.constant 0 : index
    %c0_13 = arith.constant 0 : index
    %18 = vector.load %arg5[%c0_12, %c0_13] : memref<1x128xf32, #tpu.memory_space<vmem>>, vector<1x128xf32>
    %19 = vector.broadcast %18 : vector<1x128xf32> to vector<16x128xf32>
    %20 = arith.addf %17, %19 : vector<16x128xf32>
    %cst_14 = arith.constant 5.000000e-01 : f32
    %21 = vector.broadcast %cst_14 : f32 to vector<16x128xf32>
    %22 = arith.mulf %21, %20 : vector<16x128xf32>
    %cst_15 = arith.constant 2.000000e+00 : f32
    %23 = math.sqrt %cst_15 : f32
    %cst_16 = arith.constant 1.000000e+00 : f32
    %24 = arith.divf %cst_16, %23 : f32
    %25 = vector.broadcast %24 : f32 to vector<16x128xf32>
    %26 = arith.mulf %20, %25 : vector<16x128xf32>
    %27 = math.erf %26 : vector<16x128xf32>
    %cst_17 = arith.constant 1.000000e+00 : f32
    %28 = vector.broadcast %cst_17 : f32 to vector<16x128xf32>
    %29 = arith.addf %28, %27 : vector<16x128xf32>
    %30 = arith.mulf %22, %29 : vector<16x128xf32>
    %c0_18 = arith.constant 0 : index
    %c0_19 = arith.constant 0 : index
    %31 = vector.load %arg6[%c0_18, %c0_19] : memref<128x128xf32, #tpu.memory_space<vmem>>, vector<128x128xf32>
    %cst_20 = arith.constant dense<0.000000e+00> : vector<16x128xf32>
    %32 = tpu.matmul %30, %31, %cst_20 {dimension_numbers = #tpu.dot_dimension_numbers<[1], [0], [0], [1], [0, 0, 1, 1], [], []>} : vector<16x128xf32>, vector<128x128xf32>, vector<16x128xf32> -> vector<16x128xf32>
    %c0_21 = arith.constant 0 : index
    %c0_22 = arith.constant 0 : index
    %33 = vector.load %arg7[%c0_21, %c0_22] : memref<1x128xf32, #tpu.memory_space<vmem>>, vector<1x128xf32>
    %34 = vector.broadcast %33 : vector<1x128xf32> to vector<16x128xf32>
    %35 = arith.addf %32, %34 : vector<16x128xf32>
    %c0_23 = arith.constant 0 : index
    %c0_24 = arith.constant 0 : index
    %36 = vector.load %arg8[%c0_23, %c0_24] : memref<16x128xf32, #tpu.memory_space<vmem>>, vector<16x128xf32>
    tpu.vector_store %arg8[%c0_23, %c0_24], %35 {strides = array<i32>} : memref<16x128xf32, #tpu.memory_space<vmem>>, vector<16x128xf32>,
    return
  }
  func.func @transform_0(%arg0: i32) -> (i32, i32) {
    %c0_i32 = arith.constant 0 : i32
    %c0_i32_0 = arith.constant 0 : i32
    return %arg0, %c0_i32 : i32, i32
  }
  func.func @transform_1(%arg0: i32) -> (i32, i32) {
    %c0_i32 = arith.constant 0 : i32
    %c0_i32_0 = arith.constant 0 : i32
    %c0_i32_1 = arith.constant 0 : i32
    return %c0_i32, %c0_i32_0 : i32, i32
  }
  func.func @transform_2(%arg0: i32) -> (i32, i32) {
    %c0_i32 = arith.constant 0 : i32
    %c0_i32_0 = arith.constant 0 : i32
    %c0_i32_1 = arith.constant 0 : i32
    return %c0_i32, %c0_i32_0 : i32, i32
  }
  func.func @transform_3(%arg0: i32) -> (i32, i32) {
    %c0_i32 = arith.constant 0 : i32
    %c0_i32_0 = arith.constant 0 : i32
    %c0_i32_1 = arith.constant 0 : i32
    return %c0_i32, %c0_i32_0 : i32, i32
  }
  func.func @transform_4(%arg0: i32) -> (i32, i32) {
    %c0_i32 = arith.constant 0 : i32
    %c0_i32_0 = arith.constant 0 : i32
    %c0_i32_1 = arith.constant 0 : i32
    return %c0_i32, %c0_i32_0 : i32, i32
  }
  func.func @transform_5(%arg0: i32) -> (i32, i32) {
    %c0_i32 = arith.constant 0 : i32
    %c0_i32_0 = arith.constant 0 : i32
    %c0_i32_1 = arith.constant 0 : i32
    return %c0_i32, %c0_i32_0 : i32, i32
  }
  func.func @transform_6(%arg0: i32) -> (i32, i32) {
    %c0_i32 = arith.constant 0 : i32
    %c0_i32_0 = arith.constant 0 : i32
    %c0_i32_1 = arith.constant 0 : i32
    return %c0_i32, %c0_i32_0 : i32, i32
  }
  func.func @transform_7(%arg0: i32) -> (i32, i32) {
    %c0_i32 = arith.constant 0 : i32
    %c0_i32_0 = arith.constant 0 : i32
    return %arg0, %c0_i32 : i32, i32
  }
}

</mosaic_0001>

<bundles_post_ra>
// kernel: tpu_custom_call.1
= control target key start
LH: loop header
LB: loop body
LE: loop exit
PB: predicated region body
PF: predicated region fallthrough
CT: control target
= control target key end

     0   :  { %12 = vsyncpa [#allocation3], 0  ;;  %s790_s0 = inlined_call_operand.hbm [shape: f32[16,128], index: 0, kind: input, shape index: {}]   ;;  %s791_s1 = inlined_call_operand.hbm [shape: f32[128,128], index: 1, kind: input, shape index: {}]   ;;  %s792_s2 = inlined_call_operand.vmem [shape: f32[1,128], index: 2, kind: input, shape index: {}]   ;;  %s793_s3 = inlined_call_operand.hbm [shape: f32[128,128], index: 3, kind: input, shape index: {}]   ;;  %s794_s4 = inlined_call_operand.vmem [shape: f32[1,128], index: 4, kind: input, shape index: {}]   ;;  %s795_s5 = inlined_call_operand.hbm [shape: f32[128,128], index: 5, kind: input, shape index: {}]   ;;  %s796_s6 = inlined_call_operand.vmem [shape: f32[1,128], index: 6, kind: input, shape index: {}]   ;;  %s797_s7 = inlined_call_operand.hbm [shape: f32[16,128], index: 7, kind: output, shape index: {}]  }
   0x1   :  { %13 = vsyncpa [#allocation6], 0 }
   0x2   :  { %14 = vsyncpa [#allocation9], 0 }
   0x3   :  { %15 = vsyncpa [#allocation4], 0  ;;  %s704_s24 = smov [#allocation5]   ;;  %s705_s26 = smov [#allocation2]  }
   0x4   :  { %s33_s25 = sshll.u32 %s704_s24, 4  ;;  %s21_s27 = sshll.u32 %s705_s26, 4  ;;  %s34_s25 = int_to_ptr.vmem [resolvable:$true] %s33_s25  ;;  %s22_s27 = int_to_ptr.vmem [resolvable:$true] %s21_s27 }
   0x5   :  { %s604_s28 = scalar_lea.vmem %s34_s25, 2048  ;;  %p609_p1 = scmp.lt.s32.totalorder %s34_s25, %s34_s25 }
   0x6   :  { %p605_p0 = scmp.ne.s32.totalorder %s34_s25, %s604_s28  ;;  %p610_p2 = scmp.lt.s32.totalorder %s604_s28, %s604_s28 }
   0x8   :  { %p611_p3 = por %p610_p2, %p609_p1 }
   0xa   :  { %p612_p4 = pnand %p611_p3, %p605_p0 }
   0xc   :  { %615 = shalt.err (!%p612_p4)
}
   0xd   :  { %s706_s29 = smov 128   ;;  %s707_s30 = smov 8  }
   0xe   :  { %39 = dma.hbm_to_vmem [thread:$0]  %s791_s1, 2048, %s34_s25, [#allocation6], %s706_s29, %s706_s29, %s707_s30  }
   0xf   :  { %s624_s10 = scalar_lea.vmem %s22_s27, 256  ;;  %p629_p6 = scmp.lt.s32.totalorder %s22_s27, %s22_s27 }
  0x10   :  { %p625_p5 = scmp.ne.s32.totalorder %s22_s27, %s624_s10  ;;  %p630_p7 = scmp.lt.s32.totalorder %s624_s10, %s624_s10 }
  0x12   :  { %p631_p8 = por %p630_p7, %p629_p6 }
  0x14   :  { %p632_p9 = pnand %p631_p8, %p625_p5 }
  0x16   :  { %635 = shalt.err (!%p632_p9)
}
  0x17   :  { %27 = dma.hbm_to_vmem [thread:$0]  %s790_s0, 256, %s22_s27, [#allocation3], %s706_s29, %s706_s29, %s707_s30  }
  0x18   :  { %s708_s13 = smov [#allocation7]   ;;  %s709_s15 = smov [#allocation8]  }
  0x19   :  { %s47_s14 = sshll.u32 %s708_s13, 4  ;;  %s61_s16 = sshll.u32 %s709_s15, 4  ;;  %s48_s14 = int_to_ptr.vmem [resolvable:$true] %s47_s14  ;;  %s62_s16 = int_to_ptr.vmem [resolvable:$true] %s61_s16 }
  0x1a   :  { %s644_s1 = scalar_lea.vmem %s48_s14, 2048  ;;  %p649_p11 = scmp.lt.s32.totalorder %s48_s14, %s48_s14 }
  0x1b   :  { %p645_p10 = scmp.ne.s32.totalorder %s48_s14, %s644_s1  ;;  %p650_p12 = scmp.lt.s32.totalorder %s644_s1, %s644_s1 }
  0x1d   :  { %p651_p13 = por %p650_p12, %p649_p11 }
  0x1f   :  { %p652_p0 = pnand %p651_p13, %p645_p10 }
  0x21   :  { %655 = shalt.err (!%p652_p0)
}
  0x22   :  { %53 = dma.hbm_to_vmem [thread:$0]  %s793_s3, 2048, %s48_s14, [#allocation6], %s706_s29, %s706_s29, %s707_s30  }
  0x23   :  { %s664_s0 = scalar_lea.vmem %s62_s16, 2048  ;;  %p669_p2 = scmp.lt.s32.totalorder %s62_s16, %s62_s16 }
  0x24   :  { %p665_p1 = scmp.ne.s32.totalorder %s62_s16, %s664_s0  ;;  %p670_p3 = scmp.lt.s32.totalorder %s664_s0, %s664_s0 }
  0x26   :  { %p671_p4 = por %p670_p3, %p669_p2 }
  0x28   :  { %p672_p5 = pnand %p671_p4, %p665_p1 }
  0x2a   :  { %675 = shalt.err (!%p672_p5)
}
  0x2b   :  { %67 = dma.hbm_to_vmem [thread:$0]  %s795_s5, 2048, %s62_s16, [#allocation9], %s706_s29, %s706_s29, %s707_s30  }
  0x2c   :  { %696 = dma.done.wait [#allocation3], 256  }
  0x2d   :  { %697 = vsyncadd [#allocation3], 4294967040 }
  0x2e   :  { %698 = dma.done.wait [#allocation6], 4096  }
  0x2f   :  { %699 = vsyncadd [#allocation6], 4294963200 }
  0x30   :  { %700 = dma.done.wait [#allocation9], 2048  }
  0x31   :  { %701 = vsyncadd [#allocation9], 4294965248  ;;  %v99_v0 = vld [vmem:[#allocation5 + $0x78] sm:$0xff]  ;;  %v98_v1 = vld [vmem:[#allocation5 + $0x70] sm:$0xff]  ;;  %s710_s23 = smov [#allocation10]  }
  0x32   :  { %476 = vmatprep.subr.mxu0 %v99_v0  ;;  %v97_v2 = vld [vmem:[#allocation5 + $0x68] sm:$0xff]  ;;  %v96_v3 = vld [vmem:[#allocation5 + $0x60] sm:$0xff]  ;;  %v82_v4 = vld [vmem:[#allocation2] sm:$0xff]  ;;  %s405_s24 = sshll.u32 %s710_s23, 4  ;;  %s406_s24 = int_to_ptr.vmem [resolvable:$true] %s405_s24 }
  0x33   :  { %477 = vmatpush3.msra.mxu0 %v99_v0  ;;  %v95_v5 = vld [vmem:[#allocation5 + $0x58] sm:$0xff]  ;;  %508 = vmatprep.mubr.f32.mxu0 %v82_v4  ;;  %v206_v7 = vld [vmem:[#allocation7 + $0x70] sm:$0xff]  ;;  %v205_v9 = vld [vmem:[#allocation7 + $0x68] sm:$0xff]  ;;  %s676_s25 = scalar_lea.vmem %s406_s24, 256  ;;  %p681_p7 = scmp.lt.s32.totalorder %s406_s24, %s406_s24 }
  0x34   :  { %478 = vmatprep.subr.mxu0 %v98_v1  ;;  %v207_v6 = vld [vmem:[#allocation7 + $0x78] sm:$0xff]  ;;  %v94_v8 = vld [vmem:[#allocation5 + $0x50] sm:$0xff]  ;;  %v93_v10 = vld [vmem:[#allocation5 + $0x48] sm:$0xff]  ;;  %p677_p6 = scmp.ne.s32.totalorder %s406_s24, %s676_s25  ;;  %p682_p8 = scmp.lt.s32.totalorder %s676_s25, %s676_s25 }
  0x35   :  { %479 = vmatpush3.msra.mxu0 %v98_v1  ;;  %511 = vmatprep.subr.mxu1 %v207_v6  ;;  %v92_v11 = vld [vmem:[#allocation5 + $0x40] sm:$0xff]  ;;  %v91_v12 = vld [vmem:[#allocation5 + $0x38] sm:$0xff]  ;;  %v90_v13 = vld [vmem:[#allocation5 + $0x30] sm:$0xff] }
  0x36   :  { %480 = vmatprep.subr.mxu0 %v97_v2  ;;  %512 = vmatpush3.msra.mxu1 %v207_v6  ;;  %v89_v14 = vld [vmem:[#allocation5 + $0x28] sm:$0xff]  ;;  %v88_v15 = vld [vmem:[#allocation5 + $0x20] sm:$0xff]  ;;  %v87_v16 = vld [vmem:[#allocation5 + $0x18] sm:$0xff]  ;;  %p683_p9 = por %p682_p8, %p681_p7 }
  0x37   :  { %481 = vmatpush3.msra.mxu0 %v97_v2  ;;  %513 = vmatprep.subr.mxu1 %v206_v7  ;;  %v86_v17 = vld [vmem:[#allocation5 + $0x10] sm:$0xff]  ;;  %v85_v18 = vld [vmem:[#allocation5 + $0x8] sm:$0xff]  ;;  %v84_v19 = vld [vmem:[#allocation5] sm:$0xff] }
  0x38   :  { %482 = vmatprep.subr.mxu0 %v96_v3  ;;  %514 = vmatpush3.msra.mxu1 %v206_v7  ;;  %v83_v20 = vld [vmem:[#allocation2 + $0x8] sm:$0xff]  ;;  %v204_v21 = vld [vmem:[#allocation7 + $0x60] sm:$0xff]  ;;  %v202_v23 = vld [vmem:[#allocation7 + $0x50] sm:$0xff]  ;;  %p684_p10 = pnand %p683_p9, %p677_p6 }
  0x39   :  { %483 = vmatpush3.msra.mxu0 %v96_v3  ;;  %515 = vmatprep.subr.mxu1 %v205_v9  ;;  %v203_v22 = vld [vmem:[#allocation7 + $0x58] sm:$0xff]  ;;  %v201_v24 = vld [vmem:[#allocation7 + $0x48] sm:$0xff]  ;;  %v200_v25 = vld [vmem:[#allocation7 + $0x40] sm:$0xff] }
  0x3a   :  { %484 = vmatprep.subr.mxu0 %v95_v5  ;;  %516 = vmatpush3.msra.mxu1 %v205_v9  ;;  %v199_v26 = vld [vmem:[#allocation7 + $0x38] sm:$0xff]  ;;  %v198_v27 = vld [vmem:[#allocation7 + $0x30] sm:$0xff]  ;;  %v197_v28 = vld [vmem:[#allocation7 + $0x28] sm:$0xff] }
  0x3b   :  { %485 = vmatpush3.msra.mxu0 %v95_v5  ;;  %517 = vmatprep.subr.mxu1 %v204_v21  ;;  %v196_v29 = vld [vmem:[#allocation7 + $0x20] sm:$0xff]  ;;  %v195_v30 = vld [vmem:[#allocation7 + $0x18] sm:$0xff]  ;;  %v194_v31 = vld [vmem:[#allocation7 + $0x10] sm:$0xff] }
  0x3c   :  { %486 = vmatprep.subr.mxu0 %v94_v8  ;;  %518 = vmatpush3.msra.mxu1 %v204_v21  ;;  %v193_v32 = vld [vmem:[#allocation7 + $0x8] sm:$0xff]  ;;  %v192_v33 = vld [vmem:[#allocation7] sm:$0xff]  ;;  %v315_v34 = vld [vmem:[#allocation8 + $0x78] sm:$0xff] }
  0x3d   :  { %487 = vmatpush3.msra.mxu0 %v94_v8  ;;  %519 = vmatprep.subr.mxu1 %v203_v22  ;;  %v314_v35 = vld [vmem:[#allocation8 + $0x70] sm:$0xff]  ;;  %v313_v36 = vld [vmem:[#allocation8 + $0x68] sm:$0xff]  ;;  %v312_v52 = vld [vmem:[#allocation8 + $0x60] sm:$0xff] }
  0x3e   :  { %488 = vmatprep.subr.mxu0 %v93_v10  ;;  %520 = vmatpush3.msra.mxu1 %v203_v22  ;;  %v419_v37 = vld [vmem:[%s792_s2] ss:$0 sm:$0xff]  ;;  %v311_v53 = vld [vmem:[#allocation8 + $0x58] sm:$0xff]  ;;  %v309_v55 = vld [vmem:[#allocation8 + $0x48] sm:$0xff] }
  0x3f   :  { %489 = vmatpush3.msra.mxu0 %v93_v10  ;;  %521 = vmatprep.subr.mxu1 %v202_v23  ;;  %v310_v54 = vld [vmem:[#allocation8 + $0x50] sm:$0xff]  ;;  %v308_v56 = vld [vmem:[#allocation8 + $0x40] sm:$0xff]  ;;  %v307_v57 = vld [vmem:[#allocation8 + $0x38] sm:$0xff] }
  0x40   :  { %490 = vmatprep.subr.mxu0 %v92_v11  ;;  %522 = vmatpush3.msra.mxu1 %v202_v23  ;;  %v306_v58 = vld [vmem:[#allocation8 + $0x30] sm:$0xff]  ;;  %v305_v59 = vld [vmem:[#allocation8 + $0x28] sm:$0xff]  ;;  %v304_v60 = vld [vmem:[#allocation8 + $0x20] sm:$0xff] }
  0x41   :  { %491 = vmatpush3.msra.mxu0 %v92_v11  ;;  %523 = vmatprep.subr.mxu1 %v201_v24  ;;  %v303_v61 = vld [vmem:[#allocation8 + $0x18] sm:$0xff]  ;;  %v302_v62 = vld [vmem:[#allocation8 + $0x10] sm:$0xff]  ;;  %v301_v63 = vld [vmem:[#allocation8 + $0x8] sm:$0xff] }
  0x42   :  { %492 = vmatprep.subr.mxu0 %v91_v12  ;;  %524 = vmatpush3.msra.mxu1 %v201_v24  ;;  %v300_v0 = vld [vmem:[#allocation8] sm:$0xff]  ;;  %v420_v1 = vld [vmem:[%s794_s4] ss:$0 sm:$0xff] }
  0x43   :  { %493 = vmatpush3.msra.mxu0 %v91_v12  ;;  %525 = vmatprep.subr.mxu1 %v200_v25 }
  0x44   :  { %494 = vmatprep.subr.mxu0 %v90_v13  ;;  %526 = vmatpush3.msra.mxu1 %v200_v25 }
  0x45   :  { %495 = vmatpush3.msra.mxu0 %v90_v13  ;;  %527 = vmatprep.subr.mxu1 %v199_v26 }
  0x46   :  { %496 = vmatprep.subr.mxu0 %v89_v14  ;;  %528 = vmatpush3.msra.mxu1 %v199_v26 }
  0x47   :  { %497 = vmatpush3.msra.mxu0 %v89_v14  ;;  %529 = vmatprep.subr.mxu1 %v198_v27 }
  0x48   :  { %498 = vmatprep.subr.mxu0 %v88_v15  ;;  %530 = vmatpush3.msra.mxu1 %v198_v27 }
  0x49   :  { %499 = vmatpush3.msra.mxu0 %v88_v15  ;;  %531 = vmatprep.subr.mxu1 %v197_v28 }
  0x4a   :  { %500 = vmatprep.subr.mxu0 %v87_v16  ;;  %532 = vmatpush3.msra.mxu1 %v197_v28 }
  0x4b   :  { %501 = vmatpush3.msra.mxu0 %v87_v16  ;;  %533 = vmatprep.subr.mxu1 %v196_v29  ;;  %v421_v16 = vld [vmem:[%s796_s6] ss:$0 sm:$0xff] }
  0x4c   :  { %502 = vmatprep.subr.mxu0 %v86_v17  ;;  %534 = vmatpush3.msra.mxu1 %v196_v29 }
  0x4d   :  { %503 = vmatpush3.msra.mxu0 %v86_v17  ;;  %535 = vmatprep.subr.mxu1 %v195_v30 }
  0x4e   :  { %504 = vmatprep.subr.mxu0 %v85_v18  ;;  %536 = vmatpush3.msra.mxu1 %v195_v30 }
  0x4f   :  { %505 = vmatpush3.msra.mxu0 %v85_v18  ;;  %537 = vmatprep.subr.mxu1 %v194_v31 }
  0x50   :  { %506 = vmatprep.subr.mxu0 %v84_v19  ;;  %538 = vmatpush3.msra.mxu1 %v194_v31 }
  0x51   :  { %507 = vmatpush3.msra.mxu0 %v84_v19  ;;  %539 = vmatprep.subr.mxu1 %v193_v32 }
  0x52   :  { %509 = vmatmul.mubr.f32.vlgmr.msra.gmra.mxu0 %v83_v20  ;;  %540 = vmatpush3.msra.mxu1 %v193_v32 }
  0x53   :  { %541 = vmatprep.subr.mxu1 %v192_v33  ;;  %546 = vmatprep.subr.mxu0 %v315_v34 }
  0x54   :  { %542 = vmatpush3.msra.mxu1 %v192_v33  ;;  %547 = vmatpush3.msra.mxu0 %v315_v34 }
  0x55   :  { %548 = vmatprep.subr.mxu0 %v314_v35 }
  0x56   :  { %549 = vmatpush3.msra.mxu0 %v314_v35 }
  0x57   :  { %550 = vmatprep.subr.mxu0 %v313_v36 }
  0x58   :  { %551 = vmatpush3.msra.mxu0 %v313_v36 }
  0x59   :  { %552 = vmatprep.subr.mxu0 %v312_v52 }
  0x5a   :  { %553 = vmatpush3.msra.mxu0 %v312_v52 }
  0x5b   :  { %554 = vmatprep.subr.mxu0 %v311_v53 }
  0x5c   :  { %555 = vmatpush3.msra.mxu0 %v311_v53 }
  0x5d   :  { %556 = vmatprep.subr.mxu0 %v310_v54 }
  0x5e   :  { %557 = vmatpush3.msra.mxu0 %v310_v54 }
  0x5f   :  { %558 = vmatprep.subr.mxu0 %v309_v55 }
  0x60   :  { %559 = vmatpush3.msra.mxu0 %v309_v55 }
  0x61   :  { %560 = vmatprep.subr.mxu0 %v308_v56 }
  0x62   :  { %561 = vmatpush3.msra.mxu0 %v308_v56 }
  0x63   :  { %562 = vmatprep.subr.mxu0 %v307_v57 }
  0x64   :  { %563 = vmatpush3.msra.mxu0 %v307_v57 }
  0x65   :  { %564 = vmatprep.subr.mxu0 %v306_v58 }
  0x66   :  { %565 = vmatpush3.msra.mxu0 %v306_v58 }
  0x67   :  { %566 = vmatprep.subr.mxu0 %v305_v59 }
  0x68   :  { %567 = vmatpush3.msra.mxu0 %v305_v59 }
  0x69   :  { %568 = vmatprep.subr.mxu0 %v304_v60 }
  0x6a   :  { %569 = vmatpush3.msra.mxu0 %v304_v60 }
  0x6b   :  { %570 = vmatprep.subr.mxu0 %v303_v61 }
  0x6c   :  { %571 = vmatpush3.msra.mxu0 %v303_v61 }
  0x6d   :  { %572 = vmatprep.subr.mxu0 %v302_v62 }
  0x6e   :  { %573 = vmatpush3.msra.mxu0 %v302_v62 }
  0x6f   :  { %574 = vmatprep.subr.mxu0 %v301_v63 }
  0x70   :  { %575 = vmatpush3.msra.mxu0 %v301_v63 }
  0x71   :  { %576 = vmatprep.subr.mxu0 %v300_v0 }
  0x72   :  { %577 = vmatpush3.msra.mxu0 %v300_v0 }
 0x112   :  { %v510_v38 = vpop.f32.mrf.mxu0 }
 0x113   :  { %v179_v39 = vadd.f32 %v510_v38, %v419_v37 }
 0x114   :  { %v173_v40 = vpop.f32.mrf.mxu0 }
 0x115   :  { %v185_v41 = vmul.f32 0.70710677, %v179_v39  ;;  %v174_v42 = vadd.f32 %v419_v37, %v173_v40  ;;  %v183_v49 = vmul.f32 0.5, %v179_v39 }
 0x117   :  { %588 = verf.f32 %v185_v41  ;;  %v184_v43 = vmul.f32 0.70710677, %v174_v42  ;;  %v182_v47 = vmul.f32 0.5, %v174_v42 }
 0x119   :  { %590 = verf.f32 %v184_v43 }
 0x124   :  { %v589_v44 = vpop.eup %588 }
 0x125   :  { %v189_v46 = vadd.f32 1.0, %v589_v44 }
 0x126   :  { %v591_v45 = vpop.eup %590 }
 0x127   :  { %v188_v48 = vadd.f32 1.0, %v591_v45  ;;  %v191_v51 = vmul.f32 %v189_v46, %v183_v49 }
 0x129   :  { %v190_v50 = vmul.f32 %v188_v48, %v182_v47 }
 0x12b   :  { %543 = vmatprep.mubr.f32.mxu1 %v190_v50 }
 0x12c   :  { %544 = vmatmul.mubr.f32.vlgmr.msra.gmra.mxu1 %v191_v51 }
 0x1ec   :  { %v545_v2 = vpop.f32.mrf.mxu1 }
 0x1ed   :  { %v287_v3 = vadd.f32 %v545_v2, %v420_v1 }
 0x1ee   :  { %v281_v4 = vpop.f32.mrf.mxu1 }
 0x1ef   :  { %v293_v5 = vmul.f32 0.70710677, %v287_v3  ;;  %v282_v6 = vadd.f32 %v420_v1, %v281_v4  ;;  %v291_v13 = vmul.f32 0.5, %v287_v3 }
 0x1f1   :  { %592 = verf.f32 %v293_v5  ;;  %v292_v7 = vmul.f32 0.70710677, %v282_v6  ;;  %v290_v11 = vmul.f32 0.5, %v282_v6 }
 0x1f3   :  { %594 = verf.f32 %v292_v7 }
 0x1fe   :  { %v593_v8 = vpop.eup %592 }
 0x1ff   :  { %v297_v10 = vadd.f32 1.0, %v593_v8 }
 0x200   :  { %v595_v9 = vpop.eup %594 }
 0x201   :  { %v296_v12 = vadd.f32 1.0, %v595_v9  ;;  %v299_v15 = vmul.f32 %v297_v10, %v291_v13 }
 0x203   :  { %v298_v14 = vmul.f32 %v296_v12, %v290_v11 }
 0x205   :  { %578 = vmatprep.mubr.f32.mxu0 %v298_v14 }
 0x206   :  { %579 = vmatmul.mubr.f32.vlgmr.msra.gmra.mxu0 %v299_v15 }
 0x2c6   :  { %v580_v17 = vpop.f32.mrf.mxu0 }
 0x2c7   :  { %v395_v18 = vadd.f32 %v580_v17, %v421_v16 }
 0x2c8   :  { %v389_v19 = vpop.f32.mrf.mxu0 }
 0x2c9   :  { %399 = vst [vmem:[#allocation10 + $0x8] sm:$0xff] %v395_v18  ;;  %v390_v20 = vadd.f32 %v421_v16, %v389_v19 }
 0x2cb   :  { %398 = vst [vmem:[#allocation10] sm:$0xff] %v390_v20 }
 0x2cc   :  { %687 = shalt.err (!%p684_p10)
}
 0x2cd   :  { %411 = dma.vmem_to_hbm [thread:$0]  %s406_s24, 256, %s797_s7, [#allocation4], %s706_s29, %s706_s29, %s707_s30  }
 0x2ce   :  { %702 = dma.done.wait [#allocation4], 256  }
 0x2cf   :  { %703 = vsyncadd [#allocation4], 4294967040 }
 0x2d0   :  { %415 = vsyncpa [#allocation3], 1 }
 0x2d1   :  { %416 = vsyncpa [#allocation6], 1 }
 0x2d2   :  { %417 = vsyncpa [#allocation9], 1 }
 0x2d3   :  { %418 = vsyncpa [#allocation4], 1 }

</bundles_post_ra>
